<compile_context>
chip_gen: v7x
topology: tpu7x:2x2x1
jax: 0.10.0
libtpu: 0.0.40
codegen_flags: <defaults>
</compile_context>

<pallas_src>
import jax
import jax.numpy as jnp
from jax.experimental import pallas as pl
from jax.experimental.pallas import tpu as pltpu


# --------------------------------------------------------------------------
# Kernel
# --------------------------------------------------------------------------
def _make_kernel(precision):
    def kernel(x_ref, w_ref, add_ref, o_ref):
        # x_ref:   (BB, N+1, P)  flattened patches; row 0 of each element is zeros
        # w_ref:   (E, P)        nn.Linear weight, used untransposed (contract on P)
        # add_ref: (N+1, E)      row 0: cls+pos[0];  rows 1..N: bias+pos[1:]
        # o_ref:   (BB, N+1, E)
        w = w_ref[...]
        add = add_ref[...]
        # Static unroll over the folded batch elements: each one is a clean 2-D
        # matmul, so no (BB, N+1, P) -> (BB*(N+1), P) reshape is needed (N+1 is
        # not a multiple of 8, such a merge would force a sublane relayout).
        # The kernel is HBM-bound, so per-element MXU calls cost nothing extra,
        # and every store is a whole, sublane-aligned (N+1, E) slab.
        for b in range(x_ref.shape[0]):
            y = jax.lax.dot_general(
                x_ref[b], w,
                dimension_numbers=(((1,), (1,)), ((), ())),
                preferred_element_type=jnp.float32,
                precision=precision)
            o_ref[b] = (y + add).astype(o_ref.dtype)
    return kernel


# --------------------------------------------------------------------------
# Patch extraction (wrapper side; XLA fuses it, optionally into the kernel DMA)
# --------------------------------------------------------------------------
def create_patches(x, patch_h, patch_w, *, prepend_cls_slot=False):
    """(B, C, H, W) -> (B, N[+1], C*ph*pw), matching torch unfold/permute/reshape.

    With prepend_cls_slot=True a zero row is prepended at token 0; its matmul
    output is exactly zero so the CLS content comes from the additive tensor.
    """
    B, C, H, W = x.shape
    gh, gw = H // patch_h, W // patch_w
    p = x.reshape(B, C, gh, patch_h, gw, patch_w)
    p = jnp.transpose(p, (0, 2, 4, 1, 3, 5))              # (B, gh, gw, C, ph, pw)
    p = p.reshape(B, gh * gw, C * patch_h * patch_w)      # (B, N, P)
    if prepend_cls_slot:
        p = jnp.pad(p, ((0, 0), (1, 0), (0, 0)))          # (B, N+1, P)
    return p


# --------------------------------------------------------------------------
# Sizing helpers
# --------------------------------------------------------------------------
def _vmem_capacity_bytes():
    try:
        return int(pltpu.get_tpu_info().vmem_capacity_bytes)
    except Exception:
        return 64 * 1024 * 1024   # conservative fallback (v7x per-TensorCore VMEM)


def _pick_batch_fold(batch, rows_per_elem, in_row_bytes, out_row_bytes,
                     resident_bytes, vmem_budget_bytes,
                     max_rows=2048, min_grid=2):
    """Largest divisor BB of `batch` such that
       * BB * rows_per_elem <= max_rows (amortize ~0.35us/step),
       * double-buffered in/out blocks + residents fit the VMEM budget,
       * batch // BB >= min_grid when batch allows, so the 'parallel' batch
         axis keeps >= 2 steps to shard across v7x's two TensorCores.
    """
    best = 1
    for bb in range(1, batch + 1):
        if batch % bb:
            continue
        rows = bb * rows_per_elem
        if rows > max_rows:
            break
        if 2 * rows * (in_row_bytes + out_row_bytes) + resident_bytes > vmem_budget_bytes:
            break
        if batch >= min_grid and batch // bb < min_grid:
            break
        best = bb
    return best


# --------------------------------------------------------------------------
# pallas_call builder + wrapper
# --------------------------------------------------------------------------
def _build_call(B, N1, P, E, BB, out_dtype, precision, vmem_limit_bytes,
                *, single_buffer_residents, allow_input_fusion):
    resident_kw = {}
    if single_buffer_residents:
        # Block index of weight / additive tensor never changes: one buffer is
        # enough -- saves VMEM at production ViT sizes on v7x (negligible here).
        resident_kw = dict(pipeline_mode=pl.Buffered(1))

    in_specs = [
        pl.BlockSpec((BB, N1, P), lambda g: (g, 0, 0)),            # patches (per step)
        pl.BlockSpec((E, P), lambda g: (0, 0), **resident_kw),     # weight (resident)
        pl.BlockSpec((N1, E), lambda g: (0, 0), **resident_kw),    # cls/bias/pos (resident)
    ]
    out_specs = pl.BlockSpec((BB, N1, E), lambda g: (g, 0, 0))

    return pl.pallas_call(
        _make_kernel(precision),
        out_shape=jax.ShapeDtypeStruct((B, N1, E), out_dtype),
        grid_spec=pltpu.PrefetchScalarGridSpec(
            num_scalar_prefetch=0,
            grid=(B // BB,),
            in_specs=in_specs,
            out_specs=out_specs,
        ),
        compiler_params=pltpu.CompilerParams(
            dimension_semantics=("parallel",),
            vmem_limit_bytes=vmem_limit_bytes,
            # Hint XLA to fuse the im2col (+ optional bf16 cast) producer into
            # the Pallas input DMA, removing the (B, N+1, P) HBM round trip.
            allow_input_fusion=[True, False, False] if allow_input_fusion else None,
        ),
    )


def patch_embedding_forward(x, weight, bias, cls_token, pos_embedding,
                            patch_h, patch_w, *, mxu_dtype=None):
    """
    x:             (B, C, H, W)
    weight:        (E, P)  -- nn.Linear weight (used as-is, no transpose)
    bias:          (E,)
    cls_token:     (1, 1, E)
    pos_embedding: (1, N+1, E)
    mxu_dtype:     optional dtype (e.g. jnp.bfloat16) for the matmul operands;
                   recommended on v6e/v7x (halves HBM read bytes).  Accumulation
                   and the add epilogue stay f32; output dtype follows x.
    returns        (B, N+1, E)
    """
    out_dtype = x.dtype
    B, C, H, W = x.shape
    E = weight.shape[0]
    N = (H // patch_h) * (W // patch_w)
    N1 = N + 1
    P = C * patch_h * patch_w

    # Resident additive tensor (computed once, lives in VMEM across the grid):
    #   row 0     = cls_token + pos_embedding[:, 0]
    #   rows 1..N = linear bias + pos_embedding[:, 1:]
    add_all = jnp.concatenate(
        [cls_token.reshape(1, E) + pos_embedding[0, 0:1, :],
         bias[None, :] + pos_embedding[0, 1:, :]],
        axis=0).astype(jnp.float32)                        # (N+1, E)

    xin, w = x, weight
    precision = jax.lax.Precision.HIGHEST                  # exact-f32 MXU passes
    if mxu_dtype is not None:
        # Cast BEFORE patch extraction so XLA fuses the cast into the same
        # producer as the im2col -- no standalone astype pass over x.
        xin = x.astype(mxu_dtype)
        w = weight.astype(mxu_dtype)
        precision = None                                   # native single-pass MXU

    # (B, N+1, P); token 0 of every batch element is a zero row whose matmul
    # contribution is exactly 0 (CLS content comes from add_all row 0).
    patches = create_patches(xin, patch_h, patch_w, prepend_cls_slot=True)

    in_bytes = patches.dtype.itemsize
    out_bytes = jnp.dtype(out_dtype).itemsize
    resident_bytes = 2 * (E * P * in_bytes + N1 * E * 4)   # worst case (double buffered)
    vmem_cap = _vmem_capacity_bytes()
    BB = _pick_batch_fold(B, N1,
                          in_row_bytes=P * in_bytes,
                          out_row_bytes=E * out_bytes,
                          resident_bytes=resident_bytes,
                          vmem_budget_bytes=int(0.4 * vmem_cap))
    needed = (2 * BB * N1 * (P * in_bytes + E * out_bytes)
              + resident_bytes + (2 << 20))
    vmem_limit = int(min(max(needed, 16 << 20), int(0.9 * vmem_cap), 128 << 20))

    args = (patches, w, add_all)
    try:
        out = _build_call(B, N1, P, E, BB, out_dtype, precision, vmem_limit,
                          single_buffer_residents=True,
                          allow_input_fusion=True)(*args)
    except Exception:
        # Conservative fallback if this jax/libtpu build rejects Buffered(1)
        # residents or input fusion of the patch-extraction producer.
        out = _build_call(B, N1, P, E, BB, out_dtype, precision, vmem_limit,
                          single_buffer_residents=False,
                          allow_input_fusion=False)(*args)
    return out                                             # (B, N+1, E)


# --------------------------------------------------------------------------
# Self-test
# --------------------------------------------------------------------------
if __name__ == "__main__":
    # Small config consistent with the module:
    B, C, H, W = 2, 4, 16, 16
    ph, pw = 4, 4
    E = 32
    N = (H * W) // (ph * pw)          # 64 patch tokens
    P = C * ph * pw                   # 64 flattened patch dim

    key = jax.random.PRNGKey(0)
    k_x, k_w, k_b, k_cls = jax.random.split(key, 4)

    x = jax.random.normal(k_x, (B, C, H, W), dtype=jnp.float32)

    # Deterministic parameter init (shapes from the module's __init__):
    weight = jax.random.normal(k_w, (E, P), dtype=jnp.float32) * 0.02   # nn.Linear.weight
    bias = jax.random.normal(k_b, (E,), dtype=jnp.float32) * 0.02       # nn.Linear.bias
    cls_token = jax.random.normal(k_cls, (1, 1, E), dtype=jnp.float32)  # torch.randn
    pos_embedding = jnp.zeros((1, N + 1, E), dtype=jnp.float32)         # torch.zeros

    # Pure-JAX reference (eval-mode semantics of the PyTorch module), exact f32.
    patches_ref = create_patches(x, ph, pw)
    proj = jnp.einsum('bnp,ep->bne', patches_ref, weight,
                      precision=jax.lax.Precision.HIGHEST) + bias
    ref = jnp.concatenate(
        [jnp.broadcast_to(cls_token, (B, 1, E)), proj], axis=1) + pos_embedding

    # Default f32 path: tight tolerance (both sides use exact-f32 matmul passes).
    out = patch_embedding_forward(x, weight, bias, cls_token, pos_embedding, ph, pw)
    out = jax.block_until_ready(out)
    assert out.shape == (B, N + 1, E), out.shape
    assert jnp.allclose(out, ref, rtol=1e-5, atol=2e-5), \
        float(jnp.max(jnp.abs(out - ref)))

    # bf16-input MXU path (bandwidth saver for v6e/v7x); epilogue stays f32.
    out_bf16 = patch_embedding_forward(x, weight, bias, cls_token, pos_embedding,
                                       ph, pw, mxu_dtype=jnp.bfloat16)
    out_bf16 = jax.block_until_ready(out_bf16)
    assert out_bf16.shape == (B, N + 1, E), out_bf16.shape
    assert jnp.allclose(out_bf16, ref, rtol=2e-2, atol=2e-2), \
        float(jnp.max(jnp.abs(out_bf16 - ref)))

    print("KERNEL_OK")
</pallas_src>

<mosaic_0001>
module attributes {stable_mosaic.version = 11 : i64} {
  func.func @kernel(%arg0: i32, %arg1: memref<1x17x64xf32, #tpu.memory_space<vmem>>, %arg2: memref<32x64xf32, #tpu.memory_space<vmem>>, %arg3: memref<17x32xf32, #tpu.memory_space<vmem>>, %arg4: memref<1x17x32xf32, #tpu.memory_space<vmem>>) attributes {dimension_semantics = [#tpu.dimension_semantics<parallel>], iteration_bounds = array<i64: 2>, scalar_prefetch = 0 : i64, scratch_operands = 0 : i64, tpu.core_type = #tpu.core_type<tc>, window_params = [{transform_indices = @transform_0, window_bounds = array<i64: 1, 17, 64>}, {pipeline_mode = #tpu.pipeline_mode<synchronous>, transform_indices = @transform_1, window_bounds = array<i64: 32, 64>}, {pipeline_mode = #tpu.pipeline_mode<synchronous>, transform_indices = @transform_2, window_bounds = array<i64: 17, 32>}, {transform_indices = @transform_3, window_bounds = array<i64: 1, 17, 32>}]} {
    %c0 = arith.constant 0 : index
    %c0_0 = arith.constant 0 : index
    %0 = vector.load %arg2[%c0, %c0_0] : memref<32x64xf32, #tpu.memory_space<vmem>>, vector<32x64xf32>
    %c0_1 = arith.constant 0 : index
    %c0_2 = arith.constant 0 : index
    %1 = vector.load %arg3[%c0_1, %c0_2] : memref<17x32xf32, #tpu.memory_space<vmem>>, vector<17x32xf32>
    %c0_3 = arith.constant 0 : index
    %c0_4 = arith.constant 0 : index
    %c0_5 = arith.constant 0 : index
    %2 = vector.load %arg1[%c0_3, %c0_4, %c0_5] : memref<1x17x64xf32, #tpu.memory_space<vmem>>, vector<1x17x64xf32>
    %3 = vector.shape_cast %2 : vector<1x17x64xf32> to vector<17x64xf32>
    %cst = arith.constant dense<0.000000e+00> : vector<17x32xf32>
    %4 = tpu.matmul %3, %0, %cst {dimension_numbers = #tpu.dot_dimension_numbers<[1], [1], [0], [0], [0, 0, 1, 0], [], []>, precision = #tpu.contract_precision<fp32>} : vector<17x64xf32>, vector<32x64xf32>, vector<17x32xf32> -> vector<17x32xf32>
    %5 = arith.addf %4, %1 : vector<17x32xf32>
    %c0_6 = arith.constant 0 : index
    %c0_7 = arith.constant 0 : index
    %c0_8 = arith.constant 0 : index
    %6 = vector.load %arg4[%c0_6, %c0_7, %c0_8] : memref<1x17x32xf32, #tpu.memory_space<vmem>>, vector<1x17x32xf32>
    %7 = vector.shape_cast %6 : vector<1x17x32xf32> to vector<17x32xf32>
    %8 = vector.shape_cast %5 : vector<17x32xf32> to vector<1x17x32xf32>
    tpu.vector_store %arg4[%c0_6, %c0_7, %c0_8], %8 {strides = array<i32>} : memref<1x17x32xf32, #tpu.memory_space<vmem>>, vector<1x17x32xf32>,
    return
  }
  func.func @transform_0(%arg0: i32) -> (i32, i32, i32) {
    %c0_i32 = arith.constant 0 : i32
    %c0_i32_0 = arith.constant 0 : i32
    %c0_i32_1 = arith.constant 0 : i32
    return %arg0, %c0_i32, %c0_i32_0 : i32, i32, i32
  }
  func.func @transform_1(%arg0: i32) -> (i32, i32) {
    %c0_i32 = arith.constant 0 : i32
    %c0_i32_0 = arith.constant 0 : i32
    %c0_i32_1 = arith.constant 0 : i32
    return %c0_i32, %c0_i32_0 : i32, i32
  }
  func.func @transform_2(%arg0: i32) -> (i32, i32) {
    %c0_i32 = arith.constant 0 : i32
    %c0_i32_0 = arith.constant 0 : i32
    %c0_i32_1 = arith.constant 0 : i32
    return %c0_i32, %c0_i32_0 : i32, i32
  }
  func.func @transform_3(%arg0: i32) -> (i32, i32, i32) {
    %c0_i32 = arith.constant 0 : i32
    %c0_i32_0 = arith.constant 0 : i32
    %c0_i32_1 = arith.constant 0 : i32
    return %arg0, %c0_i32, %c0_i32_0 : i32, i32, i32
  }
}

module attributes {stable_mosaic.version = 11 : i64} {
  func.func @kernel(%arg0: i32, %arg1: memref<1x17x64xf32, #tpu.memory_space<vmem>>, %arg2: memref<32x64xf32, #tpu.memory_space<vmem>>, %arg3: memref<17x32xf32, #tpu.memory_space<vmem>>, %arg4: memref<1x17x32xf32, #tpu.memory_space<vmem>>) attributes {dimension_semantics = [#tpu.dimension_semantics<parallel>], iteration_bounds = array<i64: 2>, scalar_prefetch = 0 : i64, scratch_operands = 0 : i64, tpu.core_type = #tpu.core_type<tc>, window_params = [{transform_indices = @transform_0, window_bounds = array<i64: 1, 17, 64>}, {pipeline_mode = #tpu.pipeline_mode<synchronous>, transform_indices = @transform_1, window_bounds = array<i64: 32, 64>}, {pipeline_mode = #tpu.pipeline_mode<synchronous>, transform_indices = @transform_2, window_bounds = array<i64: 17, 32>}, {transform_indices = @transform_3, window_bounds = array<i64: 1, 17, 32>}]} {
    %c0 = arith.constant 0 : index
    %c0_0 = arith.constant 0 : index
    %0 = vector.load %arg2[%c0, %c0_0] : memref<32x64xf32, #tpu.memory_space<vmem>>, vector<32x64xf32>
    %c0_1 = arith.constant 0 : index
    %c0_2 = arith.constant 0 : index
    %1 = vector.load %arg3[%c0_1, %c0_2] : memref<17x32xf32, #tpu.memory_space<vmem>>, vector<17x32xf32>
    %c0_3 = arith.constant 0 : index
    %c0_4 = arith.constant 0 : index
    %c0_5 = arith.constant 0 : index
    %2 = vector.load %arg1[%c0_3, %c0_4, %c0_5] : memref<1x17x64xf32, #tpu.memory_space<vmem>>, vector<1x17x64xf32>
    %3 = vector.shape_cast %2 : vector<1x17x64xf32> to vector<17x64xf32>
    %cst = arith.constant dense<0.000000e+00> : vector<17x32xf32>
    %4 = tpu.matmul %3, %0, %cst {dimension_numbers = #tpu.dot_dimension_numbers<[1], [1], [0], [0], [0, 0, 1, 0], [], []>, precision = #tpu.contract_precision<fp32>} : vector<17x64xf32>, vector<32x64xf32>, vector<17x32xf32> -> vector<17x32xf32>
    %5 = arith.addf %4, %1 : vector<17x32xf32>
    %c0_6 = arith.constant 0 : index
    %c0_7 = arith.constant 0 : index
    %c0_8 = arith.constant 0 : index
    %6 = vector.load %arg4[%c0_6, %c0_7, %c0_8] : memref<1x17x32xf32, #tpu.memory_space<vmem>>, vector<1x17x32xf32>
    %7 = vector.shape_cast %6 : vector<1x17x32xf32> to vector<17x32xf32>
    %8 = vector.shape_cast %5 : vector<17x32xf32> to vector<1x17x32xf32>
    tpu.vector_store %arg4[%c0_6, %c0_7, %c0_8], %8 {strides = array<i32>} : memref<1x17x32xf32, #tpu.memory_space<vmem>>, vector<1x17x32xf32>,
    return
  }
  func.func @transform_0(%arg0: i32) -> (i32, i32, i32) {
    %c0_i32 = arith.constant 0 : i32
    %c0_i32_0 = arith.constant 0 : i32
    %c0_i32_1 = arith.constant 0 : i32
    return %arg0, %c0_i32, %c0_i32_0 : i32, i32, i32
  }
  func.func @transform_1(%arg0: i32) -> (i32, i32) {
    %c0_i32 = arith.constant 0 : i32
    %c0_i32_0 = arith.constant 0 : i32
    %c0_i32_1 = arith.constant 0 : i32
    return %c0_i32, %c0_i32_0 : i32, i32
  }
  func.func @transform_2(%arg0: i32) -> (i32, i32) {
    %c0_i32 = arith.constant 0 : i32
    %c0_i32_0 = arith.constant 0 : i32
    %c0_i32_1 = arith.constant 0 : i32
    return %c0_i32, %c0_i32_0 : i32, i32
  }
  func.func @transform_3(%arg0: i32) -> (i32, i32, i32) {
    %c0_i32 = arith.constant 0 : i32
    %c0_i32_0 = arith.constant 0 : i32
    %c0_i32_1 = arith.constant 0 : i32
    return %arg0, %c0_i32, %c0_i32_0 : i32, i32, i32
  }
}

</mosaic_0001>

<bundles_post_ra>
// kernel: tpu_custom_call.1
= control target key start
LH: loop header
LB: loop body
LE: loop exit
PB: predicated region body
PF: predicated region fallthrough
CT: control target
= control target key end

     0   :  { %s1096_s12 = smov 0   ;;  %s1259_s0 = inlined_call_operand.vmem [shape: f32[2,17,64], index: 0, kind: input, shape index: {}]   ;;  %s1260_s1 = inlined_call_operand.vmem [shape: f32[32,64], index: 1, kind: input, shape index: {}]   ;;  %s1261_s2 = inlined_call_operand.vmem [shape: f32[17,32], index: 2, kind: input, shape index: {}]   ;;  %s1262_s3 = inlined_call_operand.vmem [shape: f32[2,17,32], index: 3, kind: output, shape index: {}]  }
   0x1 LB: > { %s834_s13 = sadd.s32 4294967295, %s1071_s12   ;;  %p838_p0 = scmp.ge.s32.totalorder %s1071_s12, 1  ;;  %s1071_s12 = sphi %s1096_s12, %s13_s12  }
   0x2   : > { %p137_p1 = scmp.lt.s32.totalorder %s1071_s12, 3 }
   0x4   : > { %p138_p2 = pnand %p838_p0, %p137_p1 }
   0x5   : > { %v171_v0 = vld [vmem:[%s1260_s1] sm:$0xff] (!%p138_p2)  ;;  %v172_v1 = vld [vmem:[%s1260_s1 + $0x8] sm:$0xff] (!%p138_p2)  ;;  %vm181_vm0 = vcmask (!%p138_p2), 523264   ;;  %v173_v2 = vld [vmem:[%s1260_s1 + $0x10] sm:$0xff] (!%p138_p2)  ;;  %v1073_v3 = vmov (!%p138_p2), 0.0|0.0   ;;  %p161_p3 = scmp.lt.s32.totalorder (!%p138_p2), %s834_s13, 1 }
   0x6   : > { %141 = sbr.rel (%p138_p2) target bundleno = 286 (0x11e), region = 32  ;;  %987 = vmatprep.subr.bf16.mxu1 (!%p138_p2), %v1073_v3  ;;  %1005 = vmatprep.subr.bf16.mxu0 (!%p138_p2), %v1073_v3  ;;  %v192_v4 = vsel (!%p138_p2), %vm181_vm0, %v171_v0, 0  ;;  %v195_v5 = vsel (!%p138_p2), %vm181_vm0, %v172_v1, 0  ;;  %v174_v6 = vld [vmem:[%s1260_s1 + $0x18] sm:$0xff] (!%p138_p2)  ;;  %vm1074_vm1 = vmmov (!%p138_p2), 0   ;;  %v1075_v9 = vmov (!%p138_p2), 0.0  }
   0x7   : > { %v204_v7 = vand.u32 (!%p138_p2), 4294901760, %v192_v4  ;;  %v207_v8 = vand.u32 (!%p138_p2), 4294901760, %v195_v5  ;;  %893 = vmatprep.mubr.msk.f32.mxu1 (!%p138_p2), %vm1074_vm1, %v1075_v9  ;;  %944 = vmatprep.mubr.msk.f32.mxu0 (!%p138_p2), %vm1074_vm1, %v1075_v9  ;;  %v198_v10 = vsel (!%p138_p2), %vm181_vm0, %v173_v2, 0  ;;  %v201_v11 = vsel (!%p138_p2), %vm181_vm0, %v174_v6, 0  ;;  %v175_v59 = vld [vmem:[%s1261_s2] sm:$0xff] (!%p138_p2)  ;;  %v176_v1 = vld [vmem:[%s1261_s2 + $0x8] sm:$0xff] (!%p138_p2) }
   0x8   : > { %v210_v15 = vand.u32 (!%p138_p2), 4294901760, %v198_v10  ;;  %v213_v16 = vand.u32 (!%p138_p2), 4294901760, %v201_v11  ;;  %vm774_vm2 = vcmask (!%p138_p2), 261120   ;;  %vm777_vm3 = vcmask (!%p138_p2), 253952  }
   0x9   : > { %v1128_v12 = vpack.c.bf16 (!%p138_p2), %v207_v8, %v204_v7  ;;  %v1130_v13 = vsub.f32 (!%p138_p2), %v192_v4, %v204_v7  ;;  %v1132_v14 = vsub.f32 (!%p138_p2), %v195_v5, %v207_v8  ;;  %v177_v8 = vld [vmem:[%s1261_s2 + $0x10] sm:$0x1] (!%p138_p2) }
   0xa   : > { %v1146_v19 = vsub.f32 (!%p138_p2), %v198_v10, %v210_v15  ;;  %v1148_v23 = vsub.f32 (!%p138_p2), %v201_v11, %v213_v16  ;;  %v1153_v27 = vpack.c.bf16 (!%p138_p2), %v213_v16, %v210_v15 }
   0xb   : > { %989 = vmatpush3.bf16.xpose.msra.mxu1 (!%p138_p2), %v1128_v12  ;;  %1007 = vmatpush3.bf16.xpose.msra.mxu0 (!%p138_p2), %v1128_v12  ;;  %v305_v17 = vand.u32 (!%p138_p2), 4294901760, %v1130_v13  ;;  %v312_v18 = vand.u32 (!%p138_p2), 4294901760, %v1132_v14  ;;  %v1000_v57 = vpack.c.bf16 (!%p138_p2), %v1132_v14, %v1130_v13 }
   0xc   : > { %990 = vmatprep.subr.bf16.mxu1 (!%p138_p2), %v1073_v3  ;;  %1008 = vmatprep.subr.bf16.mxu0 (!%p138_p2), %v1073_v3  ;;  %v319_v36 = vand.u32 (!%p138_p2), 4294901760, %v1146_v19  ;;  %v326_v37 = vand.u32 (!%p138_p2), 4294901760, %v1148_v23  ;;  %v1003_v58 = vpack.c.bf16 (!%p138_p2), %v1148_v23, %v1146_v19 }
   0xd   : > { %s1264_s13 = smov (!%p161_p3, %s834_s13), 1  ;;  %v306_v25 = vsub.f32 %v1130_v13, %v305_v17  ;;  %v313_v29 = vsub.f32 %v1132_v14, %v312_v18  ;;  %v1012_v43 = vpack.c.bf16 %v312_v18, %v305_v17 }
   0xe   : > { %s1053_s22 = smul.u32 24, %s1264_s13  ;;  %v320_v48 = vsub.f32 %v1146_v19, %v319_v36  ;;  %v327_v49 = vsub.f32 %v1148_v23, %v326_v37  ;;  %v1015_v56 = vpack.c.bf16 %v326_v37, %v319_v36 }
   0xf   : > { %v307_v35 = vand.u32 4294901760, %v306_v25  ;;  %v314_v39 = vand.u32 4294901760, %v313_v29 }
  0x10   : > { %s165_s25 = scalar_lea.vmem %s1259_s0, %s1053_s22  ;;  %v321_v52 = vand.u32 4294901760, %v320_v48  ;;  %v328_v53 = vand.u32 4294901760, %v327_v49  ;;  %s170_s30 = scalar_lea.vmem %s1262_s3, %s1053_s22 }
  0x11   : > { %v178_v20 = vld [vmem:[%s165_s25] sm:$0xff]  ;;  %v179_v21 = vld [vmem:[%s165_s25 + $0x8] sm:$0xff]  ;;  %v180_v22 = vld [vmem:[%s165_s25 + $0x10] sm:$0x1]  ;;  %v994_v47 = vpack.c.bf16 %v314_v39, %v307_v35 }
  0x12   : > { %v183_v24 = vsel %vm181_vm0, %v178_v20, 0  ;;  %v186_v26 = vsel %vm181_vm0, %v179_v21, 0  ;;  %v189_v31 = vsel %vm181_vm0, %v180_v22, 0  ;;  %v997_v55 = vpack.c.bf16 %v328_v53, %v321_v52 }
  0x13   : > { %v1155_v28 = vand.u32 4294901760, %v183_v24  ;;  %v1158_v30 = vand.u32 4294901760, %v186_v26  ;;  %v1167_v34 = vand.u32 4294901760, %v189_v31  ;;  %992 = vmatpush3.bf16.xpose.msra.mxu1 %v1153_v27  ;;  %1010 = vmatpush3.bf16.xpose.msra.mxu0 %v1153_v27 }
  0x14   : > { %993 = vmatprep.subr.bf16.mxu1 %v1073_v3  ;;  %1011 = vmatprep.subr.bf16.mxu0 %v1073_v3 }
  0x15   : > { %v1162_v32 = vsub.f32 %v183_v24, %v1155_v28  ;;  %v1165_v33 = vsub.f32 %v186_v26, %v1158_v30  ;;  %v1176_v41 = vsub.f32 %v189_v31, %v1167_v34 }
  0x17   : > { %v274_v38 = vand.u32 4294901760, %v1162_v32  ;;  %v284_v40 = vand.u32 4294901760, %v1165_v33  ;;  %v294_v45 = vand.u32 4294901760, %v1176_v41 }
  0x19   : > { %v275_v42 = vsub.f32 %v1162_v32, %v274_v38  ;;  %v285_v44 = vsub.f32 %v1165_v33, %v284_v40  ;;  %v295_v51 = vsub.f32 %v1176_v41, %v294_v45 }
  0x1a   : > { %945 = vmatmul.mubr.f32.vlgmr.msra.gmra.mrb[0].mxu0 %v274_v38 }
  0x1b   : > { %v276_v46 = vand.u32 4294901760, %v275_v42  ;;  %v286_v50 = vand.u32 4294901760, %v285_v44  ;;  %1013 = vmatpush3.bf16.xpose.msra.mxu0 %v1012_v43  ;;  %947 = vmatprep.mubr.msk.f32.mxu0 %vm1074_vm1, %v1075_v9  ;;  %v296_v54 = vand.u32 4294901760, %v295_v51 }
  0x1c   : > { %1014 = vmatprep.subr.bf16.mxu0 %v1073_v3 }
  0x1d   : > { %894 = vmatmul.mubr.f32.vlgmr.msra.gmra.mrb[0].mxu1 %v276_v46 }
  0x1e   : > { %995 = vmatpush3.bf16.xpose.msra.mxu1 %v994_v47  ;;  %896 = vmatprep.mubr.msk.f32.mxu1 %vm1074_vm1, %v1075_v9 }
  0x1f   : > { %996 = vmatprep.subr.bf16.mxu1 %v1073_v3  ;;  %948 = vmatmul.mubr.f32.gmra.mrb[2].mxu0 %v284_v40 }
  0x20   : > { %950 = vmatprep.mubr.msk.f32.mxu0 %vm1074_vm1, %v1075_v9 }
  0x21   : > { %897 = vmatmul.mubr.f32.gmra.mrb[2].mxu1 %v286_v50 }
  0x22   : > { %899 = vmatprep.mubr.msk.f32.mxu1 %vm1074_vm1, %v1075_v9 }
  0x23   : > { %951 = vmatmul.mubr.f32.gmra.mrb[4].mxu0 %v294_v45 }
  0x24   : > { %1016 = vmatpush3.bf16.xpose.msra.mxu0 %v1015_v56  ;;  %961 = vmatprep.mubr.msk.f32.mxu0 %vm1074_vm1, %v1075_v9 }
  0x25   : > { %900 = vmatmul.mubr.f32.gmra.mrb[4].mxu1 %v296_v54  ;;  %1017 = vmatprep.subr.bf16.mxu0 %v1073_v3 }
  0x26   : > { %998 = vmatpush3.bf16.xpose.msra.mxu1 %v997_v55  ;;  %910 = vmatprep.mubr.msk.f32.mxu1 %vm1074_vm1, %v1075_v9 }
  0x27   : > { %999 = vmatprep.subr.bf16.mxu1 %v1073_v3 }
  0x2b   : > { %962 = vmatmul.mubr.f32.vlgmr.msra.gmra.mrb[0].mxu0 %v1155_v28 }
  0x2c   : > { %1019 = vmatpush3.bf16.xpose.msra.mxu0 %v1128_v12  ;;  %964 = vmatprep.mubr.msk.f32.mxu0 %vm1074_vm1, %v1075_v9 }
  0x2d   : > { %911 = vmatmul.mubr.f32.vlgmr.msra.gmra.mrb[0].mxu1 %v1155_v28  ;;  %1020 = vmatprep.subr.bf16.mxu0 %v1073_v3 }
  0x2e   : > { %1001 = vmatpush3.bf16.xpose.msra.mxu1 %v1000_v57  ;;  %913 = vmatprep.mubr.msk.f32.mxu1 %vm1074_vm1, %v1075_v9 }
  0x2f   : > { %1002 = vmatprep.subr.bf16.mxu1 %v1073_v3  ;;  %965 = vmatmul.mubr.f32.gmra.mrb[2].mxu0 %v1158_v30 }
  0x30   : > { %967 = vmatprep.mubr.msk.f32.mxu0 %vm1074_vm1, %v1075_v9 }
  0x31   : > { %914 = vmatmul.mubr.f32.gmra.mrb[2].mxu1 %v1158_v30 }
  0x32   : > { %916 = vmatprep.mubr.msk.f32.mxu1 %vm1074_vm1, %v1075_v9 }
  0x33   : > { %968 = vmatmul.mubr.f32.gmra.mrb[4].mxu0 %v1167_v34 }
  0x34   : > { %1022 = vmatpush3.bf16.xpose.msra.mxu0 %v1153_v27  ;;  %978 = vmatprep.mubr.msk.f32.mxu0 %vm1074_vm1, %v1075_v9 }
  0x35   : > { %917 = vmatmul.mubr.f32.gmra.mrb[4].mxu1 %v1167_v34 }
  0x36   : > { %1004 = vmatpush3.bf16.xpose.msra.mxu1 %v1003_v58  ;;  %927 = vmatprep.mubr.msk.f32.mxu1 %vm1074_vm1, %v1075_v9 }
  0x3b   : > { %979 = vmatmul.mubr.f32.vlgmr.msra.gmra.mrb[0].mxu0 %v1155_v28 }
  0x3c   : > { %981 = vmatprep.mubr.msk.f32.mxu0 %vm1074_vm1, %v1075_v9 }
  0x3d   : > { %928 = vmatmul.mubr.f32.vlgmr.msra.gmra.mrb[0].mxu1 %v1162_v32 }
  0x3e   : > { %930 = vmatprep.mubr.msk.f32.mxu1 %vm1074_vm1, %v1075_v9 }
  0x3f   : > { %982 = vmatmul.mubr.f32.gmra.mrb[2].mxu0 %v1158_v30 }
  0x40   : > { %984 = vmatprep.mubr.msk.f32.mxu0 %vm1074_vm1, %v1075_v9 }
  0x41   : > { %931 = vmatmul.mubr.f32.gmra.mrb[2].mxu1 %v1165_v33 }
  0x42   : > { %933 = vmatprep.mubr.msk.f32.mxu1 %vm1074_vm1, %v1075_v9 }
  0x43   : > { %985 = vmatmul.mubr.f32.gmra.mrb[4].mxu0 %v1167_v34 }
  0x45   : > { %934 = vmatmul.mubr.f32.gmra.mrb[4].mxu1 %v1176_v41 }
 0x10e   : > { %v758_v61 = vpop.f32.mrb[0].mxu0 }
 0x10f   : > { %v980_v0 = vpop.f32.mrb[1].mxu0 }
 0x110   : > { %v481_v60 = vpop.f32.mrb[0].mxu1 }
 0x111   : > { %v1023_v62 = vadd.f32 %v481_v60, %v175_v59  ;;  %v929_v63 = vpop.f32.mrb[1].mxu1 }
 0x112   : > { %v764_v4 = vpop.f32.mrb[2].mxu0 }
 0x113   : > { %v1024_v2 = vadd.f32 %v1023_v62, %v758_v61  ;;  %v983_v7 = vpop.f32.mrb[3].mxu0 }
 0x114   : > { %v488_v3 = vpop.f32.mrb[2].mxu1 }
 0x115   : > { %775 = vst.msk [vmem:[%s170_s30] sm:$0xff] %vm774_vm2, %v1024_v2  ;;  %v1025_v5 = vadd.f32 %v488_v3, %v176_v1  ;;  %v932_v6 = vpop.f32.mrb[3].mxu1 }
 0x116   : > { %v770_v11 = vpop.f32.mrb[4].mxu0 }
 0x117   : > { %v1026_v9 = vadd.f32 %v1025_v5, %v764_v4  ;;  %v986_v14 = vpop.f32.mrb[5].mxu0 }
 0x118   : > { %v495_v10 = vpop.f32.mrb[4].mxu1 }
 0x119   : > { %776 = vst.msk [vmem:[%s170_s30 + $0x8] sm:$0xff] %vm774_vm2, %v1026_v9  ;;  %v1027_v12 = vadd.f32 %v495_v10, %v177_v8  ;;  %v935_v13 = vpop.f32.mrb[5].mxu1 }
 0x11b   : > { %v1028_v15 = vadd.f32 %v1027_v12, %v770_v11 }
 0x11d   : > { %778 = vst.msk [vmem:[%s170_s30 + $0x10] sm:$0x1] %vm777_vm3, %v1028_v15 }
 0x11e PF: > { %s13_s12 = sadd.s32 1, %s1071_s12  }
 0x11f   : > { %p10_p4 = scmp.ge.s32.totalorder %s13_s12, 4  }
 0x121   :  { %12 = sbr.rel (!%p10_p4) target bundleno = 1 (0x1), region = 62 }

// kernel: tpu_custom_call.1
= control target key start
LH: loop header
LB: loop body
LE: loop exit
PB: predicated region body
PF: predicated region fallthrough
CT: control target
= control target key end

     0   :  { %s1096_s12 = smov 0   ;;  %s1259_s0 = inlined_call_operand.vmem [shape: f32[2,17,64], index: 0, kind: input, shape index: {}]   ;;  %s1260_s1 = inlined_call_operand.vmem [shape: f32[32,64], index: 1, kind: input, shape index: {}]   ;;  %s1261_s2 = inlined_call_operand.vmem [shape: f32[17,32], index: 2, kind: input, shape index: {}]   ;;  %s1262_s3 = inlined_call_operand.vmem [shape: f32[2,17,32], index: 3, kind: output, shape index: {}]  }
   0x1 LB: > { %s834_s13 = sadd.s32 4294967295, %s1071_s12   ;;  %p838_p0 = scmp.ge.s32.totalorder %s1071_s12, 1  ;;  %s1071_s12 = sphi %s1096_s12, %s13_s12  }
   0x2   : > { %p137_p1 = scmp.lt.s32.totalorder %s1071_s12, 3 }
   0x4   : > { %p138_p2 = pnand %p838_p0, %p137_p1 }
   0x5   : > { %v171_v0 = vld [vmem:[%s1260_s1] sm:$0xff] (!%p138_p2)  ;;  %v172_v1 = vld [vmem:[%s1260_s1 + $0x8] sm:$0xff] (!%p138_p2)  ;;  %vm181_vm0 = vcmask (!%p138_p2), 523264   ;;  %v173_v2 = vld [vmem:[%s1260_s1 + $0x10] sm:$0xff] (!%p138_p2)  ;;  %v1073_v3 = vmov (!%p138_p2), 0.0|0.0   ;;  %p161_p3 = scmp.lt.s32.totalorder (!%p138_p2), %s834_s13, 1 }
   0x6   : > { %141 = sbr.rel (%p138_p2) target bundleno = 286 (0x11e), region = 32  ;;  %987 = vmatprep.subr.bf16.mxu1 (!%p138_p2), %v1073_v3  ;;  %1005 = vmatprep.subr.bf16.mxu0 (!%p138_p2), %v1073_v3  ;;  %v192_v4 = vsel (!%p138_p2), %vm181_vm0, %v171_v0, 0  ;;  %v195_v5 = vsel (!%p138_p2), %vm181_vm0, %v172_v1, 0  ;;  %v174_v6 = vld [vmem:[%s1260_s1 + $0x18] sm:$0xff] (!%p138_p2)  ;;  %vm1074_vm1 = vmmov (!%p138_p2), 0   ;;  %v1075_v9 = vmov (!%p138_p2), 0.0  }
   0x7   : > { %v204_v7 = vand.u32 (!%p138_p2), 4294901760, %v192_v4  ;;  %v207_v8 = vand.u32 (!%p138_p2), 4294901760, %v195_v5  ;;  %893 = vmatprep.mubr.msk.f32.mxu1 (!%p138_p2), %vm1074_vm1, %v1075_v9  ;;  %944 = vmatprep.mubr.msk.f32.mxu0 (!%p138_p2), %vm1074_vm1, %v1075_v9  ;;  %v198_v10 = vsel (!%p138_p2), %vm181_vm0, %v173_v2, 0  ;;  %v201_v11 = vsel (!%p138_p2), %vm181_vm0, %v174_v6, 0  ;;  %v175_v59 = vld [vmem:[%s1261_s2] sm:$0xff] (!%p138_p2)  ;;  %v176_v1 = vld [vmem:[%s1261_s2 + $0x8] sm:$0xff] (!%p138_p2) }
   0x8   : > { %v210_v15 = vand.u32 (!%p138_p2), 4294901760, %v198_v10  ;;  %v213_v16 = vand.u32 (!%p138_p2), 4294901760, %v201_v11  ;;  %vm774_vm2 = vcmask (!%p138_p2), 261120   ;;  %vm777_vm3 = vcmask (!%p138_p2), 253952  }
   0x9   : > { %v1128_v12 = vpack.c.bf16 (!%p138_p2), %v207_v8, %v204_v7  ;;  %v1130_v13 = vsub.f32 (!%p138_p2), %v192_v4, %v204_v7  ;;  %v1132_v14 = vsub.f32 (!%p138_p2), %v195_v5, %v207_v8  ;;  %v177_v8 = vld [vmem:[%s1261_s2 + $0x10] sm:$0x1] (!%p138_p2) }
   0xa   : > { %v1146_v19 = vsub.f32 (!%p138_p2), %v198_v10, %v210_v15  ;;  %v1148_v23 = vsub.f32 (!%p138_p2), %v201_v11, %v213_v16  ;;  %v1153_v27 = vpack.c.bf16 (!%p138_p2), %v213_v16, %v210_v15 }
   0xb   : > { %989 = vmatpush3.bf16.xpose.msra.mxu1 (!%p138_p2), %v1128_v12  ;;  %1007 = vmatpush3.bf16.xpose.msra.mxu0 (!%p138_p2), %v1128_v12  ;;  %v305_v17 = vand.u32 (!%p138_p2), 4294901760, %v1130_v13  ;;  %v312_v18 = vand.u32 (!%p138_p2), 4294901760, %v1132_v14  ;;  %v1000_v57 = vpack.c.bf16 (!%p138_p2), %v1132_v14, %v1130_v13 }
   0xc   : > { %990 = vmatprep.subr.bf16.mxu1 (!%p138_p2), %v1073_v3  ;;  %1008 = vmatprep.subr.bf16.mxu0 (!%p138_p2), %v1073_v3  ;;  %v319_v36 = vand.u32 (!%p138_p2), 4294901760, %v1146_v19  ;;  %v326_v37 = vand.u32 (!%p138_p2), 4294901760, %v1148_v23  ;;  %v1003_v58 = vpack.c.bf16 (!%p138_p2), %v1148_v23, %v1146_v19 }
   0xd   : > { %s1264_s13 = smov (!%p161_p3, %s834_s13), 1  ;;  %v306_v25 = vsub.f32 %v1130_v13, %v305_v17  ;;  %v313_v29 = vsub.f32 %v1132_v14, %v312_v18  ;;  %v1012_v43 = vpack.c.bf16 %v312_v18, %v305_v17 }
   0xe   : > { %s1053_s22 = smul.u32 24, %s1264_s13  ;;  %v320_v48 = vsub.f32 %v1146_v19, %v319_v36  ;;  %v327_v49 = vsub.f32 %v1148_v23, %v326_v37  ;;  %v1015_v56 = vpack.c.bf16 %v326_v37, %v319_v36 }
   0xf   : > { %v307_v35 = vand.u32 4294901760, %v306_v25  ;;  %v314_v39 = vand.u32 4294901760, %v313_v29 }
  0x10   : > { %s165_s25 = scalar_lea.vmem %s1259_s0, %s1053_s22  ;;  %v321_v52 = vand.u32 4294901760, %v320_v48  ;;  %v328_v53 = vand.u32 4294901760, %v327_v49  ;;  %s170_s30 = scalar_lea.vmem %s1262_s3, %s1053_s22 }
  0x11   : > { %v178_v20 = vld [vmem:[%s165_s25] sm:$0xff]  ;;  %v179_v21 = vld [vmem:[%s165_s25 + $0x8] sm:$0xff]  ;;  %v180_v22 = vld [vmem:[%s165_s25 + $0x10] sm:$0x1]  ;;  %v994_v47 = vpack.c.bf16 %v314_v39, %v307_v35 }
  0x12   : > { %v183_v24 = vsel %vm181_vm0, %v178_v20, 0  ;;  %v186_v26 = vsel %vm181_vm0, %v179_v21, 0  ;;  %v189_v31 = vsel %vm181_vm0, %v180_v22, 0  ;;  %v997_v55 = vpack.c.bf16 %v328_v53, %v321_v52 }
  0x13   : > { %v1155_v28 = vand.u32 4294901760, %v183_v24  ;;  %v1158_v30 = vand.u32 4294901760, %v186_v26  ;;  %v1167_v34 = vand.u32 4294901760, %v189_v31  ;;  %992 = vmatpush3.bf16.xpose.msra.mxu1 %v1153_v27  ;;  %1010 = vmatpush3.bf16.xpose.msra.mxu0 %v1153_v27 }
  0x14   : > { %993 = vmatprep.subr.bf16.mxu1 %v1073_v3  ;;  %1011 = vmatprep.subr.bf16.mxu0 %v1073_v3 }
  0x15   : > { %v1162_v32 = vsub.f32 %v183_v24, %v1155_v28  ;;  %v1165_v33 = vsub.f32 %v186_v26, %v1158_v30  ;;  %v1176_v41 = vsub.f32 %v189_v31, %v1167_v34 }
  0x17   : > { %v274_v38 = vand.u32 4294901760, %v1162_v32  ;;  %v284_v40 = vand.u32 4294901760, %v1165_v33  ;;  %v294_v45 = vand.u32 4294901760, %v1176_v41 }
  0x19   : > { %v275_v42 = vsub.f32 %v1162_v32, %v274_v38  ;;  %v285_v44 = vsub.f32 %v1165_v33, %v284_v40  ;;  %v295_v51 = vsub.f32 %v1176_v41, %v294_v45 }
  0x1a   : > { %945 = vmatmul.mubr.f32.vlgmr.msra.gmra.mrb[0].mxu0 %v274_v38 }
  0x1b   : > { %v276_v46 = vand.u32 4294901760, %v275_v42  ;;  %v286_v50 = vand.u32 4294901760, %v285_v44  ;;  %1013 = vmatpush3.bf16.xpose.msra.mxu0 %v1012_v43  ;;  %947 = vmatprep.mubr.msk.f32.mxu0 %vm1074_vm1, %v1075_v9  ;;  %v296_v54 = vand.u32 4294901760, %v295_v51 }
  0x1c   : > { %1014 = vmatprep.subr.bf16.mxu0 %v1073_v3 }
  0x1d   : > { %894 = vmatmul.mubr.f32.vlgmr.msra.gmra.mrb[0].mxu1 %v276_v46 }
  0x1e   : > { %995 = vmatpush3.bf16.xpose.msra.mxu1 %v994_v47  ;;  %896 = vmatprep.mubr.msk.f32.mxu1 %vm1074_vm1, %v1075_v9 }
  0x1f   : > { %996 = vmatprep.subr.bf16.mxu1 %v1073_v3  ;;  %948 = vmatmul.mubr.f32.gmra.mrb[2].mxu0 %v284_v40 }
  0x20   : > { %950 = vmatprep.mubr.msk.f32.mxu0 %vm1074_vm1, %v1075_v9 }
  0x21   : > { %897 = vmatmul.mubr.f32.gmra.mrb[2].mxu1 %v286_v50 }
  0x22   : > { %899 = vmatprep.mubr.msk.f32.mxu1 %vm1074_vm1, %v1075_v9 }
  0x23   : > { %951 = vmatmul.mubr.f32.gmra.mrb[4].mxu0 %v294_v45 }
  0x24   : > { %1016 = vmatpush3.bf16.xpose.msra.mxu0 %v1015_v56  ;;  %961 = vmatprep.mubr.msk.f32.mxu0 %vm1074_vm1, %v1075_v9 }
  0x25   : > { %900 = vmatmul.mubr.f32.gmra.mrb[4].mxu1 %v296_v54  ;;  %1017 = vmatprep.subr.bf16.mxu0 %v1073_v3 }
  0x26   : > { %998 = vmatpush3.bf16.xpose.msra.mxu1 %v997_v55  ;;  %910 = vmatprep.mubr.msk.f32.mxu1 %vm1074_vm1, %v1075_v9 }
  0x27   : > { %999 = vmatprep.subr.bf16.mxu1 %v1073_v3 }
  0x2b   : > { %962 = vmatmul.mubr.f32.vlgmr.msra.gmra.mrb[0].mxu0 %v1155_v28 }
  0x2c   : > { %1019 = vmatpush3.bf16.xpose.msra.mxu0 %v1128_v12  ;;  %964 = vmatprep.mubr.msk.f32.mxu0 %vm1074_vm1, %v1075_v9 }
  0x2d   : > { %911 = vmatmul.mubr.f32.vlgmr.msra.gmra.mrb[0].mxu1 %v1155_v28  ;;  %1020 = vmatprep.subr.bf16.mxu0 %v1073_v3 }
  0x2e   : > { %1001 = vmatpush3.bf16.xpose.msra.mxu1 %v1000_v57  ;;  %913 = vmatprep.mubr.msk.f32.mxu1 %vm1074_vm1, %v1075_v9 }
  0x2f   : > { %1002 = vmatprep.subr.bf16.mxu1 %v1073_v3  ;;  %965 = vmatmul.mubr.f32.gmra.mrb[2].mxu0 %v1158_v30 }
  0x30   : > { %967 = vmatprep.mubr.msk.f32.mxu0 %vm1074_vm1, %v1075_v9 }
  0x31   : > { %914 = vmatmul.mubr.f32.gmra.mrb[2].mxu1 %v1158_v30 }
  0x32   : > { %916 = vmatprep.mubr.msk.f32.mxu1 %vm1074_vm1, %v1075_v9 }
  0x33   : > { %968 = vmatmul.mubr.f32.gmra.mrb[4].mxu0 %v1167_v34 }
  0x34   : > { %1022 = vmatpush3.bf16.xpose.msra.mxu0 %v1153_v27  ;;  %978 = vmatprep.mubr.msk.f32.mxu0 %vm1074_vm1, %v1075_v9 }
  0x35   : > { %917 = vmatmul.mubr.f32.gmra.mrb[4].mxu1 %v1167_v34 }
  0x36   : > { %1004 = vmatpush3.bf16.xpose.msra.mxu1 %v1003_v58  ;;  %927 = vmatprep.mubr.msk.f32.mxu1 %vm1074_vm1, %v1075_v9 }
  0x3b   : > { %979 = vmatmul.mubr.f32.vlgmr.msra.gmra.mrb[0].mxu0 %v1155_v28 }
  0x3c   : > { %981 = vmatprep.mubr.msk.f32.mxu0 %vm1074_vm1, %v1075_v9 }
  0x3d   : > { %928 = vmatmul.mubr.f32.vlgmr.msra.gmra.mrb[0].mxu1 %v1162_v32 }
  0x3e   : > { %930 = vmatprep.mubr.msk.f32.mxu1 %vm1074_vm1, %v1075_v9 }
  0x3f   : > { %982 = vmatmul.mubr.f32.gmra.mrb[2].mxu0 %v1158_v30 }
  0x40   : > { %984 = vmatprep.mubr.msk.f32.mxu0 %vm1074_vm1, %v1075_v9 }
  0x41   : > { %931 = vmatmul.mubr.f32.gmra.mrb[2].mxu1 %v1165_v33 }
  0x42   : > { %933 = vmatprep.mubr.msk.f32.mxu1 %vm1074_vm1, %v1075_v9 }
  0x43   : > { %985 = vmatmul.mubr.f32.gmra.mrb[4].mxu0 %v1167_v34 }
  0x45   : > { %934 = vmatmul.mubr.f32.gmra.mrb[4].mxu1 %v1176_v41 }
 0x10e   : > { %v758_v61 = vpop.f32.mrb[0].mxu0 }
 0x10f   : > { %v980_v0 = vpop.f32.mrb[1].mxu0 }
 0x110   : > { %v481_v60 = vpop.f32.mrb[0].mxu1 }
 0x111   : > { %v1023_v62 = vadd.f32 %v481_v60, %v175_v59  ;;  %v929_v63 = vpop.f32.mrb[1].mxu1 }
 0x112   : > { %v764_v4 = vpop.f32.mrb[2].mxu0 }
 0x113   : > { %v1024_v2 = vadd.f32 %v1023_v62, %v758_v61  ;;  %v983_v7 = vpop.f32.mrb[3].mxu0 }
 0x114   : > { %v488_v3 = vpop.f32.mrb[2].mxu1 }
 0x115   : > { %775 = vst.msk [vmem:[%s170_s30] sm:$0xff] %vm774_vm2, %v1024_v2  ;;  %v1025_v5 = vadd.f32 %v488_v3, %v176_v1  ;;  %v932_v6 = vpop.f32.mrb[3].mxu1 }
 0x116   : > { %v770_v11 = vpop.f32.mrb[4].mxu0 }
 0x117   : > { %v1026_v9 = vadd.f32 %v1025_v5, %v764_v4  ;;  %v986_v14 = vpop.f32.mrb[5].mxu0 }
 0x118   : > { %v495_v10 = vpop.f32.mrb[4].mxu1 }
 0x119   : > { %776 = vst.msk [vmem:[%s170_s30 + $0x8] sm:$0xff] %vm774_vm2, %v1026_v9  ;;  %v1027_v12 = vadd.f32 %v495_v10, %v177_v8  ;;  %v935_v13 = vpop.f32.mrb[5].mxu1 }
 0x11b   : > { %v1028_v15 = vadd.f32 %v1027_v12, %v770_v11 }
 0x11d   : > { %778 = vst.msk [vmem:[%s170_s30 + $0x10] sm:$0x1] %vm777_vm3, %v1028_v15 }
 0x11e PF: > { %s13_s12 = sadd.s32 1, %s1071_s12  }
 0x11f   : > { %p10_p4 = scmp.ge.s32.totalorder %s13_s12, 4  }
 0x121   :  { %12 = sbr.rel (!%p10_p4) target bundleno = 1 (0x1), region = 62 }

</bundles_post_ra>
